<compile_context>
chip_gen: v5e
topology: v5e:2x2
jax: 0.10.0
libtpu: 0.0.40
codegen_flags: <defaults>
</compile_context>

<pallas_src>
import functools
import math

import jax
import jax.numpy as jnp
from jax import lax
from jax.experimental import pallas as pl
from jax.experimental.pallas import tpu as pltpu


# ----------------------------------------------------------------------------------
# Helpers
# ----------------------------------------------------------------------------------

def _full_spec(a):
    return pl.BlockSpec(a.shape, lambda *_: (0,) * a.ndim)


def _choose_tb(batch, seq, target_rows=256):
    """Batch block so TB*S fills the MXU M dim, but keep >=2 grid steps when B>1
    so both v7x TensorCores get work."""
    tb = max(1, min(batch, max(1, target_rows // max(seq, 1))))
    if batch > 1 and pl.cdiv(batch, tb) < 2:
        tb = pl.cdiv(batch, 2)
    return tb


def _vmem_budget(arrays, act_bytes):
    """Explicit scoped-VMEM budget: resident weights + pipelined activations + margin,
    clamped to limits that are safe on v5e (16 MiB default) and v7x (64 MiB total)."""
    w_bytes = sum(int(a.size) * a.dtype.itemsize for a in arrays)
    est = 2 * w_bytes + 16 * int(act_bytes) + (8 << 20)
    return int(max(16 << 20, min(est, 48 << 20)))


# ----------------------------------------------------------------------------------
# Kernel 1: input projection + temporal convs (roll-based taps) + temporal
#           projection + residual + positional encoding
# ----------------------------------------------------------------------------------

def input_conv_pe_kernel(x_ref, w_in_ref, b_in_ref, w_conv_ref, b_conv_ref,
                         w_tp_ref, b_tp_ref, pe_ref, o_ref, *, kernel_sizes):
    TB, S, Din = x_ref.shape
    D = w_in_ref.shape[1]
    M = TB * S
    bf16 = jnp.bfloat16

    # input projection on the flattened (TB*S, Din) slab
    x = x_ref[...].reshape(M, Din).astype(bf16)
    h = jnp.dot(x, w_in_ref[...], preferred_element_type=jnp.float32) + b_in_ref[...]

    # shifted conv taps via XLU sublane roll + per-sequence edge masking
    k_max = max(kernel_sizes)
    pad = k_max // 2
    row = lax.broadcasted_iota(jnp.int32, (M, 1), 0) % S    # position within sequence
    taps = {}
    for d in range(-pad, pad + 1):
        if d == 0:
            t = h
        else:
            t = pltpu.roll(h, shift=(-d) % M, axis=0)
            t = jnp.where((row + d >= 0) & (row + d < S), t, 0.0)
        taps[d] = t.astype(bf16)

    # per-kernel conv (only its own nonzero (D, D) tap blocks) + ReLU, folded
    # directly into the temporal projection so no (M, n_k*D) concat is materialized
    x_conv = None
    row_off = 0
    for ki, ks in enumerate(kernel_sizes):
        p = ks // 2
        acc = None
        for t_idx in range(ks):
            wblk = w_conv_ref[row_off + t_idx * D: row_off + (t_idx + 1) * D, :]
            c = jnp.dot(taps[t_idx - p], wblk, preferred_element_type=jnp.float32)
            acc = c if acc is None else acc + c
        row_off += ks * D
        conv_k = jnp.maximum(acc + b_conv_ref[ki], 0.0).astype(bf16)      # (M, D)
        wtp_k = w_tp_ref[ki * D:(ki + 1) * D, :]                          # (D, D)
        proj = jnp.dot(conv_k, wtp_k, preferred_element_type=jnp.float32)
        x_conv = proj if x_conv is None else x_conv + proj
    x_conv = x_conv + b_tp_ref[...]

    out = (h + x_conv).reshape(TB, S, D) + pe_ref[...].reshape(1, S, D)
    o_ref[...] = out


def input_conv_pe(x, params):
    B, S, Din = x.shape
    D = params["w_in"].shape[1]
    kernel_sizes = tuple(params["kernel_sizes"])
    tb = _choose_tb(B, S)
    nb = pl.cdiv(B, tb)
    pe = params["pe"][:S]                                                 # (S, D)

    weights = (params["w_in"], params["b_in"], params["w_conv"], params["b_conv"],
               params["w_tp"], params["b_tp"], pe)

    return pl.pallas_call(
        functools.partial(input_conv_pe_kernel, kernel_sizes=kernel_sizes),
        out_shape=jax.ShapeDtypeStruct((B, S, D), jnp.float32),
        grid=(nb,),
        in_specs=[pl.BlockSpec((tb, S, Din), lambda b: (b, 0, 0))]
                 + [_full_spec(a) for a in weights],
        out_specs=pl.BlockSpec((tb, S, D), lambda b: (b, 0, 0)),
        compiler_params=pltpu.CompilerParams(
            dimension_semantics=("parallel",),
            vmem_limit_bytes=_vmem_budget(weights, tb * S * max(D, Din) * 4)),
    )(x, *weights)


# ----------------------------------------------------------------------------------
# Kernel 2: ALL transformer layers fused (QKV + sliced-head MHA + out-proj + LN +
#           FFN + LN, looped over stacked per-layer weights resident in VMEM)
# ----------------------------------------------------------------------------------

def transformer_blocks_kernel(h_ref, wqkv_ref, bqkv_ref, wo_ref, bo_ref,
                              g1_ref, be1_ref, w1_ref, b1_ref, w2_ref, b2_ref,
                              g2_ref, be2_ref, o_ref, *, n_layers, n_heads, eps):
    TB, S, D = h_ref.shape
    M = TB * S
    dk = D // n_heads
    bf16 = jnp.bfloat16

    x = h_ref[...].reshape(M, D)                                          # (M, D) f32

    # TODO(synk): head/batch loops stay as unrolled Python loops (tiny trip counts
    # here); convert to lax.fori_loop(..., unroll=True) for large n_heads/TB.
    for l in range(n_layers):
        # fused QKV projection (softmax scale pre-folded into wq/bq)
        qkv = jnp.dot(x.astype(bf16), wqkv_ref[l],
                      preferred_element_type=jnp.float32) + bqkv_ref[l]   # (M, 3D)

        # per-sequence, per-head attention with dk-sliced operands
        ctx_rows = []
        for b in range(TB):
            r0 = b * S
            qkv_b = qkv[r0:r0 + S, :]                                     # (S, 3D)
            head_ctx = []
            for hd in range(n_heads):
                c0 = hd * dk
                qh = qkv_b[:, c0:c0 + dk].astype(bf16)
                kh = qkv_b[:, D + c0:D + c0 + dk].astype(bf16)
                vh = qkv_b[:, 2 * D + c0:2 * D + c0 + dk].astype(bf16)
                s = lax.dot_general(qh, kh, (((1,), (1,)), ((), ())),
                                    preferred_element_type=jnp.float32)   # (S, S)
                s_max = jnp.max(s, axis=-1, keepdims=True)
                e = jnp.exp(s - s_max)
                p = e * pl.reciprocal(jnp.sum(e, axis=-1, keepdims=True), approx=True)
                head_ctx.append(jnp.dot(p.astype(bf16), vh,
                                        preferred_element_type=jnp.float32))  # (S, dk)
            ctx_rows.append(head_ctx[0] if n_heads == 1
                            else jnp.concatenate(head_ctx, axis=1))       # (S, D)
        ctx = ctx_rows[0] if TB == 1 else jnp.concatenate(ctx_rows, axis=0)   # (M, D)

        attn = jnp.dot(ctx.astype(bf16), wo_ref[l],
                       preferred_element_type=jnp.float32) + bo_ref[l]

        # add & LayerNorm 1
        z = x + attn
        mu = jnp.mean(z, axis=-1, keepdims=True)
        var = jnp.mean(jnp.square(z - mu), axis=-1, keepdims=True)
        h1 = (z - mu) * lax.rsqrt(var + eps) * g1_ref[l] + be1_ref[l]

        # feed-forward
        f = jnp.maximum(jnp.dot(h1.astype(bf16), w1_ref[l],
                                preferred_element_type=jnp.float32) + b1_ref[l], 0.0)
        ff = jnp.dot(f.astype(bf16), w2_ref[l],
                     preferred_element_type=jnp.float32) + b2_ref[l]

        # add & LayerNorm 2
        z2 = h1 + ff
        mu2 = jnp.mean(z2, axis=-1, keepdims=True)
        var2 = jnp.mean(jnp.square(z2 - mu2), axis=-1, keepdims=True)
        x = (z2 - mu2) * lax.rsqrt(var2 + eps) * g2_ref[l] + be2_ref[l]

    o_ref[...] = x.reshape(TB, S, D)


def transformer_blocks(h, bp, *, n_heads, eps=1e-5):
    B, S, D = h.shape
    L = bp["wqkv"].shape[0]
    d_ff = bp["w_ff1"].shape[2]
    tb = _choose_tb(B, S)
    nb = pl.cdiv(B, tb)

    weights = (bp["wqkv"], bp["bqkv"], bp["wo"], bp["bo"],
               bp["ln1_g"], bp["ln1_b"],
               bp["w_ff1"], bp["b_ff1"], bp["w_ff2"], bp["b_ff2"],
               bp["ln2_g"], bp["ln2_b"])

    return pl.pallas_call(
        functools.partial(transformer_blocks_kernel,
                          n_layers=L, n_heads=n_heads, eps=eps),
        out_shape=jax.ShapeDtypeStruct((B, S, D), jnp.float32),
        grid=(nb,),
        in_specs=[pl.BlockSpec((tb, S, D), lambda b: (b, 0, 0))]
                 + [_full_spec(a) for a in weights],
        out_specs=pl.BlockSpec((tb, S, D), lambda b: (b, 0, 0)),
        compiler_params=pltpu.CompilerParams(
            dimension_semantics=("parallel",),
            vmem_limit_bytes=_vmem_budget(weights, tb * S * max(3 * D, d_ff) * 4)),
    )(h, *weights)


# ----------------------------------------------------------------------------------
# Kernel 3: mean pooling + fused prediction / uncertainty / confidence heads,
#           lane-dense (., 128) output slab
# ----------------------------------------------------------------------------------

def pooled_heads_kernel(h_ref, w1_ref, b1_ref, w2_ref, b2_ref, o_ref,
                        *, n_out, inv_s):
    TBp = h_ref.shape[0]
    bf16 = jnp.bfloat16

    pooled = (jnp.sum(h_ref[...], axis=1) * inv_s).astype(bf16)           # (TBp, D)
    h1 = jnp.maximum(jnp.dot(pooled, w1_ref[...],
                             preferred_element_type=jnp.float32) + b1_ref[...], 0.0)
    out = jnp.dot(h1.astype(bf16), w2_ref[...],
                  preferred_element_type=jnp.float32) + b2_ref[...]       # (TBp, 128)

    col = lax.broadcasted_iota(jnp.int32, out.shape, 1)
    res = jnp.where(col < n_out, out,
          jnp.where(col < 2 * n_out, jax.nn.softplus(out),
          jnp.where(col < 2 * n_out + 1, jax.nn.sigmoid(out), 0.0)))
    o_ref[...] = res.reshape(TBp, 1, res.shape[-1])


def pooled_heads(h, params):
    B, S, D = h.shape
    n_out = params["n_outputs"]
    out_pad = params["w_h2"].shape[1]                                     # 128
    tb = _choose_tb(B, 1)
    nb = pl.cdiv(B, tb)

    weights = (params["w_h1"], params["b_h1"], params["w_h2"], params["b_h2"])

    slab = pl.pallas_call(
        functools.partial(pooled_heads_kernel, n_out=n_out, inv_s=1.0 / S),
        out_shape=jax.ShapeDtypeStruct((B, 1, out_pad), jnp.float32),
        grid=(nb,),
        in_specs=[pl.BlockSpec((tb, S, D), lambda b: (b, 0, 0))]
                 + [_full_spec(a) for a in weights],
        out_specs=pl.BlockSpec((tb, 1, out_pad), lambda b: (b, 0, 0)),
        compiler_params=pltpu.CompilerParams(
            dimension_semantics=("parallel",),
            vmem_limit_bytes=_vmem_budget(weights, tb * S * D * 4)),
    )(h, *weights)

    slab = slab[:, 0, :]
    return {"predictions": slab[:, :n_out],
            "uncertainty": slab[:, n_out:2 * n_out],
            "confidence": slab[:, 2 * n_out:2 * n_out + 1]}


# ----------------------------------------------------------------------------------
# Forward pass
# ----------------------------------------------------------------------------------

def temporal_transformer_forward(x, params, *, n_heads):
    # TODO(synk): lengths-based padding mask path not implemented (lengths=None only).
    # TODO(synk): return_attention / attention_weights_history not returned.
    h = input_conv_pe(x, params)
    h = transformer_blocks(h, params["blocks"], n_heads=n_heads)
    return pooled_heads(h, params)


# ----------------------------------------------------------------------------------
# Deterministic parameter construction (fused / stacked / bf16 layouts)
# ----------------------------------------------------------------------------------

def make_params(key, *, input_dim, d_model, n_heads, n_layers, d_ff, n_outputs,
                max_seq_len, kernel_sizes):
    keys = iter(jax.random.split(key, 1024))
    bf16 = jnp.bfloat16

    def W(shape, scale=0.05):
        return (scale * jax.random.normal(next(keys), shape)).astype(jnp.float32)

    def Bias(n):
        return (0.01 * jax.random.normal(next(keys), (1, n))).astype(jnp.float32)

    # positional encoding buffer (max_seq_len, d_model), kept in f32
    position = jnp.arange(max_seq_len, dtype=jnp.float32)[:, None]
    div_term = jnp.exp(
        jnp.arange(0, d_model, 2, dtype=jnp.float32) * (-math.log(10000.0) / d_model))
    pe = jnp.zeros((max_seq_len, d_model), jnp.float32)
    pe = pe.at[:, 0::2].set(jnp.sin(position * div_term))
    pe = pe.at[:, 1::2].set(jnp.cos(position * div_term))

    # temporal convs: per-kernel tap weights stacked tap-major (sum_k ks*D, D) bf16
    w_conv_blocks, b_conv_blocks = [], []
    for ks in kernel_sizes:
        wk = W((ks, d_model, d_model))                 # (K, D_in, D_out)
        w_conv_blocks.append(wk.reshape(ks * d_model, d_model))
        b_conv_blocks.append(Bias(d_model)[None])      # (1, 1, D)
    w_conv = jnp.concatenate(w_conv_blocks, axis=0).astype(bf16)
    b_conv = jnp.concatenate(b_conv_blocks, axis=0)    # (n_k, 1, D) f32

    # output heads: fused first layer + block-diagonal second layer padded to 128 lanes
    d_half, d_quarter = d_model // 2, d_model // 4
    out_pad = 128
    wp1, wu1, wc1 = W((d_model, d_half)), W((d_model, d_half)), W((d_model, d_quarter))
    bp1, bu1, bc1 = Bias(d_half), Bias(d_half), Bias(d_quarter)
    w_h1 = jnp.concatenate([wp1, wu1, wc1], axis=1).astype(bf16)
    b_h1 = jnp.concatenate([bp1, bu1, bc1], axis=1)
    wp2, wu2, wc2 = W((d_half, n_outputs)), W((d_half, n_outputs)), W((d_quarter, 1))
    bp2, bu2, bc2 = Bias(n_outputs), Bias(n_outputs), Bias(1)
    w_h2 = jnp.zeros((2 * d_half + d_quarter, out_pad), jnp.float32)
    w_h2 = w_h2.at[0:d_half, 0:n_outputs].set(wp2)
    w_h2 = w_h2.at[d_half:2 * d_half, n_outputs:2 * n_outputs].set(wu2)
    w_h2 = w_h2.at[2 * d_half:, 2 * n_outputs:2 * n_outputs + 1].set(wc2)
    b_h2 = jnp.zeros((1, out_pad), jnp.float32)
    b_h2 = b_h2.at[:, 0:n_outputs].set(bp2)
    b_h2 = b_h2.at[:, n_outputs:2 * n_outputs].set(bu2)
    b_h2 = b_h2.at[:, 2 * n_outputs:2 * n_outputs + 1].set(bc2)
    w_h2 = w_h2.astype(bf16)

    # transformer layers, stacked along a leading layer axis; softmax scale folded
    # into wq/bq at construction time
    scale = 1.0 / math.sqrt(d_model // n_heads)
    stacks = {k: [] for k in ("wqkv", "bqkv", "wo", "bo", "ln1_g", "ln1_b",
                              "w_ff1", "b_ff1", "w_ff2", "b_ff2", "ln2_g", "ln2_b")}
    for _ in range(n_layers):
        wq, wk_, wv = W((d_model, d_model)), W((d_model, d_model)), W((d_model, d_model))
        bq, bk, bv = Bias(d_model), Bias(d_model), Bias(d_model)
        stacks["wqkv"].append(jnp.concatenate([wq * scale, wk_, wv], axis=1))
        stacks["bqkv"].append(jnp.concatenate([bq * scale, bk, bv], axis=1))
        stacks["wo"].append(W((d_model, d_model)))
        stacks["bo"].append(Bias(d_model))
        stacks["ln1_g"].append(jnp.ones((1, d_model), jnp.float32))
        stacks["ln1_b"].append(jnp.zeros((1, d_model), jnp.float32))
        stacks["w_ff1"].append(W((d_model, d_ff)))
        stacks["b_ff1"].append(Bias(d_ff))
        stacks["w_ff2"].append(W((d_ff, d_model)))
        stacks["b_ff2"].append(Bias(d_model))
        stacks["ln2_g"].append(jnp.ones((1, d_model), jnp.float32))
        stacks["ln2_b"].append(jnp.zeros((1, d_model), jnp.float32))
    blocks = {k: jnp.stack(v) for k, v in stacks.items()}
    for k in ("wqkv", "wo", "w_ff1", "w_ff2"):
        blocks[k] = blocks[k].astype(bf16)

    return {
        "w_in": W((input_dim, d_model)).astype(bf16), "b_in": Bias(d_model),
        "pe": pe,
        "kernel_sizes": tuple(kernel_sizes),
        "n_outputs": n_outputs,
        "w_conv": w_conv, "b_conv": b_conv,
        "w_tp": W((d_model * len(kernel_sizes), d_model)).astype(bf16),
        "b_tp": Bias(d_model),
        "blocks": blocks,
        "w_h1": w_h1, "b_h1": b_h1, "w_h2": w_h2, "b_h2": b_h2,
    }


# ----------------------------------------------------------------------------------

if __name__ == "__main__":
    # small, module-consistent shapes
    B, S, INPUT_DIM = 2, 8, 8
    D_MODEL, N_HEADS, N_LAYERS, D_FF = 32, 4, 2, 64
    N_OUTPUTS, MAX_SEQ_LEN = 1, 100
    KERNEL_SIZES = [3, 5, 7]

    key = jax.random.PRNGKey(0)
    k_x, k_p = jax.random.split(key)
    x = jax.random.normal(k_x, (B, S, INPUT_DIM), dtype=jnp.float32)

    params = make_params(
        k_p,
        input_dim=INPUT_DIM, d_model=D_MODEL, n_heads=N_HEADS, n_layers=N_LAYERS,
        d_ff=D_FF, n_outputs=N_OUTPUTS, max_seq_len=MAX_SEQ_LEN,
        kernel_sizes=KERNEL_SIZES,
    )

    out = temporal_transformer_forward(x, params, n_heads=N_HEADS)
    out = jax.block_until_ready(out)

    assert out["predictions"].shape == (B, N_OUTPUTS)
    assert out["uncertainty"].shape == (B, N_OUTPUTS)
    assert out["confidence"].shape == (B, 1)
    assert bool(jnp.all(out["uncertainty"] >= 0.0))
    assert bool(jnp.all((out["confidence"] >= 0.0) & (out["confidence"] <= 1.0)))
    assert bool(jnp.all(jnp.isfinite(out["predictions"])))
    assert bool(jnp.all(jnp.isfinite(out["uncertainty"])))
    print("KERNEL_OK")
</pallas_src>

<mosaic_0001>
module attributes {stable_mosaic.version = 11 : i64} {
  func.func @input_conv_pe_kernel(%arg0: i32, %arg1: memref<1x8x8xf32, #tpu.memory_space<vmem>>, %arg2: memref<8x32xbf16, #tpu.memory_space<vmem>>, %arg3: memref<1x32xf32, #tpu.memory_space<vmem>>, %arg4: memref<480x32xbf16, #tpu.memory_space<vmem>>, %arg5: memref<3x1x32xf32, #tpu.memory_space<vmem>>, %arg6: memref<96x32xbf16, #tpu.memory_space<vmem>>, %arg7: memref<1x32xf32, #tpu.memory_space<vmem>>, %arg8: memref<8x32xf32, #tpu.memory_space<vmem>>, %arg9: memref<1x8x32xf32, #tpu.memory_space<vmem>>) attributes {dimension_semantics = [#tpu.dimension_semantics<parallel>], iteration_bounds = array<i64: 2>, scalar_prefetch = 0 : i64, scratch_operands = 0 : i64, tpu.core_type = #tpu.core_type<tc>, window_params = [{transform_indices = @transform_0, window_bounds = array<i64: 1, 8, 8>}, {pipeline_mode = #tpu.pipeline_mode<synchronous>, transform_indices = @transform_1, window_bounds = array<i64: 8, 32>}, {pipeline_mode = #tpu.pipeline_mode<synchronous>, transform_indices = @transform_2, window_bounds = array<i64: 1, 32>}, {pipeline_mode = #tpu.pipeline_mode<synchronous>, transform_indices = @transform_3, window_bounds = array<i64: 480, 32>}, {pipeline_mode = #tpu.pipeline_mode<synchronous>, transform_indices = @transform_4, window_bounds = array<i64: 3, 1, 32>}, {pipeline_mode = #tpu.pipeline_mode<synchronous>, transform_indices = @transform_5, window_bounds = array<i64: 96, 32>}, {pipeline_mode = #tpu.pipeline_mode<synchronous>, transform_indices = @transform_6, window_bounds = array<i64: 1, 32>}, {pipeline_mode = #tpu.pipeline_mode<synchronous>, transform_indices = @transform_7, window_bounds = array<i64: 8, 32>}, {transform_indices = @transform_8, window_bounds = array<i64: 1, 8, 32>}]} {
    %c0 = arith.constant 0 : index
    %c0_0 = arith.constant 0 : index
    %c0_1 = arith.constant 0 : index
    %0 = vector.load %arg1[%c0, %c0_0, %c0_1] : memref<1x8x8xf32, #tpu.memory_space<vmem>>, vector<1x8x8xf32>
    %1 = vector.shape_cast %0 : vector<1x8x8xf32> to vector<8x8xf32>
    %2 = arith.truncf %1 : vector<8x8xf32> to vector<8x8xbf16>
    %c0_2 = arith.constant 0 : index
    %c0_3 = arith.constant 0 : index
    %3 = vector.load %arg2[%c0_2, %c0_3] : memref<8x32xbf16, #tpu.memory_space<vmem>>, vector<8x32xbf16>
    %cst = arith.constant dense<0.000000e+00> : vector<8x32xf32>
    %4 = tpu.matmul %2, %3, %cst {dimension_numbers = #tpu.dot_dimension_numbers<[1], [0], [0], [1], [0, 0, 1, 1], [], []>} : vector<8x8xbf16>, vector<8x32xbf16>, vector<8x32xf32> -> vector<8x32xf32>
    %c0_4 = arith.constant 0 : index
    %c0_5 = arith.constant 0 : index
    %5 = vector.load %arg3[%c0_4, %c0_5] : memref<1x32xf32, #tpu.memory_space<vmem>>, vector<1x32xf32>
    %6 = vector.broadcast %5 : vector<1x32xf32> to vector<8x32xf32>
    %7 = arith.addf %4, %6 : vector<8x32xf32>
    %8 = tpu.iota {dimensions = array<i32: 0>} : vector<8x1xi32>
    %c8_i32 = arith.constant 8 : i32
    %c0_i32 = arith.constant 0 : i32
    %9 = arith.cmpi eq, %c8_i32, %c0_i32 : i32
    %c1_i32 = arith.constant 1 : i32
    %10 = arith.select %9, %c1_i32, %c8_i32 : i32
    %11 = vector.broadcast %10 : i32 to vector<8x1xi32>
    %12 = arith.remsi %8, %11 : vector<8x1xi32>
    %c0_i32_6 = arith.constant 0 : i32
    %13 = vector.broadcast %c0_i32_6 : i32 to vector<8x1xi32>
    %14 = arith.cmpi ne, %12, %13 : vector<8x1xi32>
    %c0_i32_7 = arith.constant 0 : i32
    %15 = vector.broadcast %c0_i32_7 : i32 to vector<8x1xi32>
    %16 = arith.cmpi slt, %12, %15 : vector<8x1xi32>
    %c0_i32_8 = arith.constant 0 : i32
    %17 = arith.cmpi slt, %10, %c0_i32_8 : i32
    %18 = vector.broadcast %17 : i1 to vector<8x1xi1>
    %19 = vector.broadcast %18 : vector<8x1xi1> to vector<8x1xi1>
    %20 = arith.xori %16, %19 : vector<8x1xi1>
    %21 = arith.andi %20, %14 : vector<8x1xi1>
    %22 = vector.broadcast %10 : i32 to vector<8x1xi32>
    %23 = arith.addi %12, %22 : vector<8x1xi32>
    %24 = arith.select %21, %23, %12 : vector<8x1xi1>, vector<8x1xi32>
    %c3_i32 = arith.constant 3 : i32
    %25 = tpu.dynamic_rotate %7 by %c3_i32 dim 0 : vector<8x32xf32>, i32 -> vector<8x32xf32>
    %c-3_i32 = arith.constant -3 : i32
    %26 = vector.broadcast %c-3_i32 : i32 to vector<8x1xi32>
    %27 = arith.addi %24, %26 : vector<8x1xi32>
    %c0_i32_9 = arith.constant 0 : i32
    %28 = vector.broadcast %c0_i32_9 : i32 to vector<8x1xi32>
    %29 = arith.cmpi sge, %27, %28 : vector<8x1xi32>
    %c-3_i32_10 = arith.constant -3 : i32
    %30 = vector.broadcast %c-3_i32_10 : i32 to vector<8x1xi32>
    %31 = arith.addi %24, %30 : vector<8x1xi32>
    %c8_i32_11 = arith.constant 8 : i32
    %32 = vector.broadcast %c8_i32_11 : i32 to vector<8x1xi32>
    %33 = arith.cmpi slt, %31, %32 : vector<8x1xi32>
    %34 = arith.andi %29, %33 : vector<8x1xi1>
    %cst_12 = arith.constant 0.000000e+00 : f32
    %35 = vector.shape_cast %34 : vector<8x1xi1> to vector<8x1xi1>
    %36 = vector.broadcast %35 : vector<8x1xi1> to vector<8x32xi1>
    %37 = vector.broadcast %cst_12 : f32 to vector<8x32xf32>
    %38 = arith.select %36, %25, %37 : vector<8x32xi1>, vector<8x32xf32>
    %39 = arith.truncf %38 : vector<8x32xf32> to vector<8x32xbf16>
    %c2_i32 = arith.constant 2 : i32
    %40 = tpu.dynamic_rotate %7 by %c2_i32 dim 0 : vector<8x32xf32>, i32 -> vector<8x32xf32>
    %c-2_i32 = arith.constant -2 : i32
    %41 = vector.broadcast %c-2_i32 : i32 to vector<8x1xi32>
    %42 = arith.addi %24, %41 : vector<8x1xi32>
    %c0_i32_13 = arith.constant 0 : i32
    %43 = vector.broadcast %c0_i32_13 : i32 to vector<8x1xi32>
    %44 = arith.cmpi sge, %42, %43 : vector<8x1xi32>
    %c-2_i32_14 = arith.constant -2 : i32
    %45 = vector.broadcast %c-2_i32_14 : i32 to vector<8x1xi32>
    %46 = arith.addi %24, %45 : vector<8x1xi32>
    %c8_i32_15 = arith.constant 8 : i32
    %47 = vector.broadcast %c8_i32_15 : i32 to vector<8x1xi32>
    %48 = arith.cmpi slt, %46, %47 : vector<8x1xi32>
    %49 = arith.andi %44, %48 : vector<8x1xi1>
    %cst_16 = arith.constant 0.000000e+00 : f32
    %50 = vector.shape_cast %49 : vector<8x1xi1> to vector<8x1xi1>
    %51 = vector.broadcast %50 : vector<8x1xi1> to vector<8x32xi1>
    %52 = vector.broadcast %cst_16 : f32 to vector<8x32xf32>
    %53 = arith.select %51, %40, %52 : vector<8x32xi1>, vector<8x32xf32>
    %54 = arith.truncf %53 : vector<8x32xf32> to vector<8x32xbf16>
    %c1_i32_17 = arith.constant 1 : i32
    %55 = tpu.dynamic_rotate %7 by %c1_i32_17 dim 0 : vector<8x32xf32>, i32 -> vector<8x32xf32>
    %c-1_i32 = arith.constant -1 : i32
    %56 = vector.broadcast %c-1_i32 : i32 to vector<8x1xi32>
    %57 = arith.addi %24, %56 : vector<8x1xi32>
    %c0_i32_18 = arith.constant 0 : i32
    %58 = vector.broadcast %c0_i32_18 : i32 to vector<8x1xi32>
    %59 = arith.cmpi sge, %57, %58 : vector<8x1xi32>
    %c-1_i32_19 = arith.constant -1 : i32
    %60 = vector.broadcast %c-1_i32_19 : i32 to vector<8x1xi32>
    %61 = arith.addi %24, %60 : vector<8x1xi32>
    %c8_i32_20 = arith.constant 8 : i32
    %62 = vector.broadcast %c8_i32_20 : i32 to vector<8x1xi32>
    %63 = arith.cmpi slt, %61, %62 : vector<8x1xi32>
    %64 = arith.andi %59, %63 : vector<8x1xi1>
    %cst_21 = arith.constant 0.000000e+00 : f32
    %65 = vector.shape_cast %64 : vector<8x1xi1> to vector<8x1xi1>
    %66 = vector.broadcast %65 : vector<8x1xi1> to vector<8x32xi1>
    %67 = vector.broadcast %cst_21 : f32 to vector<8x32xf32>
    %68 = arith.select %66, %55, %67 : vector<8x32xi1>, vector<8x32xf32>
    %69 = arith.truncf %68 : vector<8x32xf32> to vector<8x32xbf16>
    %70 = arith.truncf %7 : vector<8x32xf32> to vector<8x32xbf16>
    %c7_i32 = arith.constant 7 : i32
    %71 = tpu.dynamic_rotate %7 by %c7_i32 dim 0 : vector<8x32xf32>, i32 -> vector<8x32xf32>
    %c1_i32_22 = arith.constant 1 : i32
    %72 = vector.broadcast %c1_i32_22 : i32 to vector<8x1xi32>
    %73 = arith.addi %24, %72 : vector<8x1xi32>
    %c0_i32_23 = arith.constant 0 : i32
    %74 = vector.broadcast %c0_i32_23 : i32 to vector<8x1xi32>
    %75 = arith.cmpi sge, %73, %74 : vector<8x1xi32>
    %c1_i32_24 = arith.constant 1 : i32
    %76 = vector.broadcast %c1_i32_24 : i32 to vector<8x1xi32>
    %77 = arith.addi %24, %76 : vector<8x1xi32>
    %c8_i32_25 = arith.constant 8 : i32
    %78 = vector.broadcast %c8_i32_25 : i32 to vector<8x1xi32>
    %79 = arith.cmpi slt, %77, %78 : vector<8x1xi32>
    %80 = arith.andi %75, %79 : vector<8x1xi1>
    %cst_26 = arith.constant 0.000000e+00 : f32
    %81 = vector.shape_cast %80 : vector<8x1xi1> to vector<8x1xi1>
    %82 = vector.broadcast %81 : vector<8x1xi1> to vector<8x32xi1>
    %83 = vector.broadcast %cst_26 : f32 to vector<8x32xf32>
    %84 = arith.select %82, %71, %83 : vector<8x32xi1>, vector<8x32xf32>
    %85 = arith.truncf %84 : vector<8x32xf32> to vector<8x32xbf16>
    %c6_i32 = arith.constant 6 : i32
    %86 = tpu.dynamic_rotate %7 by %c6_i32 dim 0 : vector<8x32xf32>, i32 -> vector<8x32xf32>
    %c2_i32_27 = arith.constant 2 : i32
    %87 = vector.broadcast %c2_i32_27 : i32 to vector<8x1xi32>
    %88 = arith.addi %24, %87 : vector<8x1xi32>
    %c0_i32_28 = arith.constant 0 : i32
    %89 = vector.broadcast %c0_i32_28 : i32 to vector<8x1xi32>
    %90 = arith.cmpi sge, %88, %89 : vector<8x1xi32>
    %c2_i32_29 = arith.constant 2 : i32
    %91 = vector.broadcast %c2_i32_29 : i32 to vector<8x1xi32>
    %92 = arith.addi %24, %91 : vector<8x1xi32>
    %c8_i32_30 = arith.constant 8 : i32
    %93 = vector.broadcast %c8_i32_30 : i32 to vector<8x1xi32>
    %94 = arith.cmpi slt, %92, %93 : vector<8x1xi32>
    %95 = arith.andi %90, %94 : vector<8x1xi1>
    %cst_31 = arith.constant 0.000000e+00 : f32
    %96 = vector.shape_cast %95 : vector<8x1xi1> to vector<8x1xi1>
    %97 = vector.broadcast %96 : vector<8x1xi1> to vector<8x32xi1>
    %98 = vector.broadcast %cst_31 : f32 to vector<8x32xf32>
    %99 = arith.select %97, %86, %98 : vector<8x32xi1>, vector<8x32xf32>
    %100 = arith.truncf %99 : vector<8x32xf32> to vector<8x32xbf16>
    %c5_i32 = arith.constant 5 : i32
    %101 = tpu.dynamic_rotate %7 by %c5_i32 dim 0 : vector<8x32xf32>, i32 -> vector<8x32xf32>
    %c3_i32_32 = arith.constant 3 : i32
    %102 = vector.broadcast %c3_i32_32 : i32 to vector<8x1xi32>
    %103 = arith.addi %24, %102 : vector<8x1xi32>
    %c0_i32_33 = arith.constant 0 : i32
    %104 = vector.broadcast %c0_i32_33 : i32 to vector<8x1xi32>
    %105 = arith.cmpi sge, %103, %104 : vector<8x1xi32>
    %c3_i32_34 = arith.constant 3 : i32
    %106 = vector.broadcast %c3_i32_34 : i32 to vector<8x1xi32>
    %107 = arith.addi %24, %106 : vector<8x1xi32>
    %c8_i32_35 = arith.constant 8 : i32
    %108 = vector.broadcast %c8_i32_35 : i32 to vector<8x1xi32>
    %109 = arith.cmpi slt, %107, %108 : vector<8x1xi32>
    %110 = arith.andi %105, %109 : vector<8x1xi1>
    %cst_36 = arith.constant 0.000000e+00 : f32
    %111 = vector.shape_cast %110 : vector<8x1xi1> to vector<8x1xi1>
    %112 = vector.broadcast %111 : vector<8x1xi1> to vector<8x32xi1>
    %113 = vector.broadcast %cst_36 : f32 to vector<8x32xf32>
    %114 = arith.select %112, %101, %113 : vector<8x32xi1>, vector<8x32xf32>
    %115 = arith.truncf %114 : vector<8x32xf32> to vector<8x32xbf16>
    %c0_37 = arith.constant 0 : index
    %c0_38 = arith.constant 0 : index
    %116 = vector.load %arg4[%c0_37, %c0_38] : memref<480x32xbf16, #tpu.memory_space<vmem>>, vector<32x32xbf16>
    %cst_39 = arith.constant dense<0.000000e+00> : vector<8x32xf32>
    %117 = tpu.matmul %69, %116, %cst_39 {dimension_numbers = #tpu.dot_dimension_numbers<[1], [0], [0], [1], [0, 0, 1, 1], [], []>} : vector<8x32xbf16>, vector<32x32xbf16>, vector<8x32xf32> -> vector<8x32xf32>
    %c32 = arith.constant 32 : index
    %c0_40 = arith.constant 0 : index
    %118 = vector.load %arg4[%c32, %c0_40] : memref<480x32xbf16, #tpu.memory_space<vmem>>, vector<32x32xbf16>
    %cst_41 = arith.constant dense<0.000000e+00> : vector<8x32xf32>
    %119 = tpu.matmul %70, %118, %cst_41 {dimension_numbers = #tpu.dot_dimension_numbers<[1], [0], [0], [1], [0, 0, 1, 1], [], []>} : vector<8x32xbf16>, vector<32x32xbf16>, vector<8x32xf32> -> vector<8x32xf32>
    %120 = arith.addf %117, %119 : vector<8x32xf32>
    %c64 = arith.constant 64 : index
    %c0_42 = arith.constant 0 : index
    %121 = vector.load %arg4[%c64, %c0_42] : memref<480x32xbf16, #tpu.memory_space<vmem>>, vector<32x32xbf16>
    %cst_43 = arith.constant dense<0.000000e+00> : vector<8x32xf32>
    %122 = tpu.matmul %85, %121, %cst_43 {dimension_numbers = #tpu.dot_dimension_numbers<[1], [0], [0], [1], [0, 0, 1, 1], [], []>} : vector<8x32xbf16>, vector<32x32xbf16>, vector<8x32xf32> -> vector<8x32xf32>
    %123 = arith.addf %120, %122 : vector<8x32xf32>
    %c0_44 = arith.constant 0 : index
    %c0_45 = arith.constant 0 : index
    %c0_46 = arith.constant 0 : index
    %124 = vector.load %arg5[%c0_44, %c0_45, %c0_46] : memref<3x1x32xf32, #tpu.memory_space<vmem>>, vector<1x1x32xf32>
    %125 = vector.shape_cast %124 : vector<1x1x32xf32> to vector<1x32xf32>
    %126 = vector.broadcast %125 : vector<1x32xf32> to vector<8x32xf32>
    %127 = arith.addf %123, %126 : vector<8x32xf32>
    %cst_47 = arith.constant 0.000000e+00 : f32
    %128 = vector.broadcast %cst_47 : f32 to vector<8x32xf32>
    %129 = arith.maximumf %127, %128 : vector<8x32xf32>
    %130 = arith.truncf %129 : vector<8x32xf32> to vector<8x32xbf16>
    %c0_48 = arith.constant 0 : index
    %c0_49 = arith.constant 0 : index
    %131 = vector.load %arg6[%c0_48, %c0_49] : memref<96x32xbf16, #tpu.memory_space<vmem>>, vector<32x32xbf16>
    %cst_50 = arith.constant dense<0.000000e+00> : vector<8x32xf32>
    %132 = tpu.matmul %130, %131, %cst_50 {dimension_numbers = #tpu.dot_dimension_numbers<[1], [0], [0], [1], [0, 0, 1, 1], [], []>} : vector<8x32xbf16>, vector<32x32xbf16>, vector<8x32xf32> -> vector<8x32xf32>
    %c96 = arith.constant 96 : index
    %c0_51 = arith.constant 0 : index
    %133 = vector.load %arg4[%c96, %c0_51] : memref<480x32xbf16, #tpu.memory_space<vmem>>, vector<32x32xbf16>
    %cst_52 = arith.constant dense<0.000000e+00> : vector<8x32xf32>
    %134 = tpu.matmul %54, %133, %cst_52 {dimension_numbers = #tpu.dot_dimension_numbers<[1], [0], [0], [1], [0, 0, 1, 1], [], []>} : vector<8x32xbf16>, vector<32x32xbf16>, vector<8x32xf32> -> vector<8x32xf32>
    %c128 = arith.constant 128 : index
    %c0_53 = arith.constant 0 : index
    %135 = vector.load %arg4[%c128, %c0_53] : memref<480x32xbf16, #tpu.memory_space<vmem>>, vector<32x32xbf16>
    %cst_54 = arith.constant dense<0.000000e+00> : vector<8x32xf32>
    %136 = tpu.matmul %69, %135, %cst_54 {dimension_numbers = #tpu.dot_dimension_numbers<[1], [0], [0], [1], [0, 0, 1, 1], [], []>} : vector<8x32xbf16>, vector<32x32xbf16>, vector<8x32xf32> -> vector<8x32xf32>
    %137 = arith.addf %134, %136 : vector<8x32xf32>
    %c160 = arith.constant 160 : index
    %c0_55 = arith.constant 0 : index
    %138 = vector.load %arg4[%c160, %c0_55] : memref<480x32xbf16, #tpu.memory_space<vmem>>, vector<32x32xbf16>
    %cst_56 = arith.constant dense<0.000000e+00> : vector<8x32xf32>
    %139 = tpu.matmul %70, %138, %cst_56 {dimension_numbers = #tpu.dot_dimension_numbers<[1], [0], [0], [1], [0, 0, 1, 1], [], []>} : vector<8x32xbf16>, vector<32x32xbf16>, vector<8x32xf32> -> vector<8x32xf32>
    %140 = arith.addf %137, %139 : vector<8x32xf32>
    %c192 = arith.constant 192 : index
    %c0_57 = arith.constant 0 : index
    %141 = vector.load %arg4[%c192, %c0_57] : memref<480x32xbf16, #tpu.memory_space<vmem>>, vector<32x32xbf16>
    %cst_58 = arith.constant dense<0.000000e+00> : vector<8x32xf32>
    %142 = tpu.matmul %85, %141, %cst_58 {dimension_numbers = #tpu.dot_dimension_numbers<[1], [0], [0], [1], [0, 0, 1, 1], [], []>} : vector<8x32xbf16>, vector<32x32xbf16>, vector<8x32xf32> -> vector<8x32xf32>
    %143 = arith.addf %140, %142 : vector<8x32xf32>
    %c224 = arith.constant 224 : index
    %c0_59 = arith.constant 0 : index
    %144 = vector.load %arg4[%c224, %c0_59] : memref<480x32xbf16, #tpu.memory_space<vmem>>, vector<32x32xbf16>
    %cst_60 = arith.constant dense<0.000000e+00> : vector<8x32xf32>
    %145 = tpu.matmul %100, %144, %cst_60 {dimension_numbers = #tpu.dot_dimension_numbers<[1], [0], [0], [1], [0, 0, 1, 1], [], []>} : vector<8x32xbf16>, vector<32x32xbf16>, vector<8x32xf32> -> vector<8x32xf32>
    %146 = arith.addf %143, %145 : vector<8x32xf32>
    %c1 = arith.constant 1 : index
    %c0_61 = arith.constant 0 : index
    %c0_62 = arith.constant 0 : index
    %147 = vector.load %arg5[%c1, %c0_61, %c0_62] : memref<3x1x32xf32, #tpu.memory_space<vmem>>, vector<1x1x32xf32>
    %148 = vector.shape_cast %147 : vector<1x1x32xf32> to vector<1x32xf32>
    %149 = vector.broadcast %148 : vector<1x32xf32> to vector<8x32xf32>
    %150 = arith.addf %146, %149 : vector<8x32xf32>
    %cst_63 = arith.constant 0.000000e+00 : f32
    %151 = vector.broadcast %cst_63 : f32 to vector<8x32xf32>
    %152 = arith.maximumf %150, %151 : vector<8x32xf32>
    %153 = arith.truncf %152 : vector<8x32xf32> to vector<8x32xbf16>
    %c32_64 = arith.constant 32 : index
    %c0_65 = arith.constant 0 : index
    %154 = vector.load %arg6[%c32_64, %c0_65] : memref<96x32xbf16, #tpu.memory_space<vmem>>, vector<32x32xbf16>
    %cst_66 = arith.constant dense<0.000000e+00> : vector<8x32xf32>
    %155 = tpu.matmul %153, %154, %cst_66 {dimension_numbers = #tpu.dot_dimension_numbers<[1], [0], [0], [1], [0, 0, 1, 1], [], []>} : vector<8x32xbf16>, vector<32x32xbf16>, vector<8x32xf32> -> vector<8x32xf32>
    %156 = arith.addf %132, %155 : vector<8x32xf32>
    %c256 = arith.constant 256 : index
    %c0_67 = arith.constant 0 : index
    %157 = vector.load %arg4[%c256, %c0_67] : memref<480x32xbf16, #tpu.memory_space<vmem>>, vector<32x32xbf16>
    %cst_68 = arith.constant dense<0.000000e+00> : vector<8x32xf32>
    %158 = tpu.matmul %39, %157, %cst_68 {dimension_numbers = #tpu.dot_dimension_numbers<[1], [0], [0], [1], [0, 0, 1, 1], [], []>} : vector<8x32xbf16>, vector<32x32xbf16>, vector<8x32xf32> -> vector<8x32xf32>
    %c288 = arith.constant 288 : index
    %c0_69 = arith.constant 0 : index
    %159 = vector.load %arg4[%c288, %c0_69] : memref<480x32xbf16, #tpu.memory_space<vmem>>, vector<32x32xbf16>
    %cst_70 = arith.constant dense<0.000000e+00> : vector<8x32xf32>
    %160 = tpu.matmul %54, %159, %cst_70 {dimension_numbers = #tpu.dot_dimension_numbers<[1], [0], [0], [1], [0, 0, 1, 1], [], []>} : vector<8x32xbf16>, vector<32x32xbf16>, vector<8x32xf32> -> vector<8x32xf32>
    %161 = arith.addf %158, %160 : vector<8x32xf32>
    %c320 = arith.constant 320 : index
    %c0_71 = arith.constant 0 : index
    %162 = vector.load %arg4[%c320, %c0_71] : memref<480x32xbf16, #tpu.memory_space<vmem>>, vector<32x32xbf16>
    %cst_72 = arith.constant dense<0.000000e+00> : vector<8x32xf32>
    %163 = tpu.matmul %69, %162, %cst_72 {dimension_numbers = #tpu.dot_dimension_numbers<[1], [0], [0], [1], [0, 0, 1, 1], [], []>} : vector<8x32xbf16>, vector<32x32xbf16>, vector<8x32xf32> -> vector<8x32xf32>
    %164 = arith.addf %161, %163 : vector<8x32xf32>
    %c352 = arith.constant 352 : index
    %c0_73 = arith.constant 0 : index
    %165 = vector.load %arg4[%c352, %c0_73] : memref<480x32xbf16, #tpu.memory_space<vmem>>, vector<32x32xbf16>
    %cst_74 = arith.constant dense<0.000000e+00> : vector<8x32xf32>
    %166 = tpu.matmul %70, %165, %cst_74 {dimension_numbers = #tpu.dot_dimension_numbers<[1], [0], [0], [1], [0, 0, 1, 1], [], []>} : vector<8x32xbf16>, vector<32x32xbf16>, vector<8x32xf32> -> vector<8x32xf32>
    %167 = arith.addf %164, %166 : vector<8x32xf32>
    %c384 = arith.constant 384 : index
    %c0_75 = arith.constant 0 : index
    %168 = vector.load %arg4[%c384, %c0_75] : memref<480x32xbf16, #tpu.memory_space<vmem>>, vector<32x32xbf16>
    %cst_76 = arith.constant dense<0.000000e+00> : vector<8x32xf32>
    %169 = tpu.matmul %85, %168, %cst_76 {dimension_numbers = #tpu.dot_dimension_numbers<[1], [0], [0], [1], [0, 0, 1, 1], [], []>} : vector<8x32xbf16>, vector<32x32xbf16>, vector<8x32xf32> -> vector<8x32xf32>
    %170 = arith.addf %167, %169 : vector<8x32xf32>
    %c416 = arith.constant 416 : index
    %c0_77 = arith.constant 0 : index
    %171 = vector.load %arg4[%c416, %c0_77] : memref<480x32xbf16, #tpu.memory_space<vmem>>, vector<32x32xbf16>
    %cst_78 = arith.constant dense<0.000000e+00> : vector<8x32xf32>
    %172 = tpu.matmul %100, %171, %cst_78 {dimension_numbers = #tpu.dot_dimension_numbers<[1], [0], [0], [1], [0, 0, 1, 1], [], []>} : vector<8x32xbf16>, vector<32x32xbf16>, vector<8x32xf32> -> vector<8x32xf32>
    %173 = arith.addf %170, %172 : vector<8x32xf32>
    %c448 = arith.constant 448 : index
    %c0_79 = arith.constant 0 : index
    %174 = vector.load %arg4[%c448, %c0_79] : memref<480x32xbf16, #tpu.memory_space<vmem>>, vector<32x32xbf16>
    %cst_80 = arith.constant dense<0.000000e+00> : vector<8x32xf32>
    %175 = tpu.matmul %115, %174, %cst_80 {dimension_numbers = #tpu.dot_dimension_numbers<[1], [0], [0], [1], [0, 0, 1, 1], [], []>} : vector<8x32xbf16>, vector<32x32xbf16>, vector<8x32xf32> -> vector<8x32xf32>
    %176 = arith.addf %173, %175 : vector<8x32xf32>
    %c2 = arith.constant 2 : index
    %c0_81 = arith.constant 0 : index
    %c0_82 = arith.constant 0 : index
    %177 = vector.load %arg5[%c2, %c0_81, %c0_82] : memref<3x1x32xf32, #tpu.memory_space<vmem>>, vector<1x1x32xf32>
    %178 = vector.shape_cast %177 : vector<1x1x32xf32> to vector<1x32xf32>
    %179 = vector.broadcast %178 : vector<1x32xf32> to vector<8x32xf32>
    %180 = arith.addf %176, %179 : vector<8x32xf32>
    %cst_83 = arith.constant 0.000000e+00 : f32
    %181 = vector.broadcast %cst_83 : f32 to vector<8x32xf32>
    %182 = arith.maximumf %180, %181 : vector<8x32xf32>
    %183 = arith.truncf %182 : vector<8x32xf32> to vector<8x32xbf16>
    %c64_84 = arith.constant 64 : index
    %c0_85 = arith.constant 0 : index
    %184 = vector.load %arg6[%c64_84, %c0_85] : memref<96x32xbf16, #tpu.memory_space<vmem>>, vector<32x32xbf16>
    %cst_86 = arith.constant dense<0.000000e+00> : vector<8x32xf32>
    %185 = tpu.matmul %183, %184, %cst_86 {dimension_numbers = #tpu.dot_dimension_numbers<[1], [0], [0], [1], [0, 0, 1, 1], [], []>} : vector<8x32xbf16>, vector<32x32xbf16>, vector<8x32xf32> -> vector<8x32xf32>
    %186 = arith.addf %156, %185 : vector<8x32xf32>
    %c0_87 = arith.constant 0 : index
    %c0_88 = arith.constant 0 : index
    %187 = vector.load %arg7[%c0_87, %c0_88] : memref<1x32xf32, #tpu.memory_space<vmem>>, vector<1x32xf32>
    %188 = vector.broadcast %187 : vector<1x32xf32> to vector<8x32xf32>
    %189 = arith.addf %186, %188 : vector<8x32xf32>
    %190 = arith.addf %7, %189 : vector<8x32xf32>
    %191 = vector.shape_cast %190 : vector<8x32xf32> to vector<1x8x32xf32>
    %c0_89 = arith.constant 0 : index
    %c0_90 = arith.constant 0 : index
    %192 = vector.load %arg8[%c0_89, %c0_90] : memref<8x32xf32, #tpu.memory_space<vmem>>, vector<8x32xf32>
    %193 = vector.shape_cast %192 : vector<8x32xf32> to vector<1x8x32xf32>
    %194 = arith.addf %191, %193 : vector<1x8x32xf32>
    %c0_91 = arith.constant 0 : index
    %c0_92 = arith.constant 0 : index
    %c0_93 = arith.constant 0 : index
    %195 = vector.load %arg9[%c0_91, %c0_92, %c0_93] : memref<1x8x32xf32, #tpu.memory_space<vmem>>, vector<1x8x32xf32>
    tpu.vector_store %arg9[%c0_91, %c0_92, %c0_93], %194 {strides = array<i32>} : memref<1x8x32xf32, #tpu.memory_space<vmem>>, vector<1x8x32xf32>,
    return
  }
  func.func @transform_0(%arg0: i32) -> (i32, i32, i32) {
    %c0_i32 = arith.constant 0 : i32
    %c0_i32_0 = arith.constant 0 : i32
    %c0_i32_1 = arith.constant 0 : i32
    return %arg0, %c0_i32, %c0_i32_0 : i32, i32, i32
  }
  func.func @transform_1(%arg0: i32) -> (i32, i32) {
    %c0_i32 = arith.constant 0 : i32
    %c0_i32_0 = arith.constant 0 : i32
    %c0_i32_1 = arith.constant 0 : i32
    return %c0_i32, %c0_i32_0 : i32, i32
  }
  func.func @transform_2(%arg0: i32) -> (i32, i32) {
    %c0_i32 = arith.constant 0 : i32
    %c0_i32_0 = arith.constant 0 : i32
    %c0_i32_1 = arith.constant 0 : i32
    return %c0_i32, %c0_i32_0 : i32, i32
  }
  func.func @transform_3(%arg0: i32) -> (i32, i32) {
    %c0_i32 = arith.constant 0 : i32
    %c0_i32_0 = arith.constant 0 : i32
    %c0_i32_1 = arith.constant 0 : i32
    return %c0_i32, %c0_i32_0 : i32, i32
  }
  func.func @transform_4(%arg0: i32) -> (i32, i32, i32) {
    %c0_i32 = arith.constant 0 : i32
    %c0_i32_0 = arith.constant 0 : i32
    %c0_i32_1 = arith.constant 0 : i32
    %c0_i32_2 = arith.constant 0 : i32
    return %c0_i32, %c0_i32_0, %c0_i32_1 : i32, i32, i32
  }
  func.func @transform_5(%arg0: i32) -> (i32, i32) {
    %c0_i32 = arith.constant 0 : i32
    %c0_i32_0 = arith.constant 0 : i32
    %c0_i32_1 = arith.constant 0 : i32
    return %c0_i32, %c0_i32_0 : i32, i32
  }
  func.func @transform_6(%arg0: i32) -> (i32, i32) {
    %c0_i32 = arith.constant 0 : i32
    %c0_i32_0 = arith.constant 0 : i32
    %c0_i32_1 = arith.constant 0 : i32
    return %c0_i32, %c0_i32_0 : i32, i32
  }
  func.func @transform_7(%arg0: i32) -> (i32, i32) {
    %c0_i32 = arith.constant 0 : i32
    %c0_i32_0 = arith.constant 0 : i32
    %c0_i32_1 = arith.constant 0 : i32
    return %c0_i32, %c0_i32_0 : i32, i32
  }
  func.func @transform_8(%arg0: i32) -> (i32, i32, i32) {
    %c0_i32 = arith.constant 0 : i32
    %c0_i32_0 = arith.constant 0 : i32
    %c0_i32_1 = arith.constant 0 : i32
    return %arg0, %c0_i32, %c0_i32_0 : i32, i32, i32
  }
}

</mosaic_0001>

<bundles_post_ra>
// kernel: tpu_custom_call.1
= control target key start
LH: loop header
LB: loop body
LE: loop exit
PB: predicated region body
PF: predicated region fallthrough
CT: control target
= control target key end

     0   :  { %13 = vsyncpa [#allocation3], 0  ;;  %s1695_s0 = inlined_call_operand.vmem [shape: f32[2,8,8], index: 0, kind: input, shape index: {}]   ;;  %s1696_s1 = inlined_call_operand.vmem [shape: bf16[8,32], index: 1, kind: input, shape index: {}]   ;;  %s1697_s2 = inlined_call_operand.vmem [shape: f32[1,32], index: 2, kind: input, shape index: {}]   ;;  %s1698_s3 = inlined_call_operand.vmem [shape: bf16[480,32], index: 3, kind: input, shape index: {}]   ;;  %s1699_s4 = inlined_call_operand.vmem [shape: f32[3,1,32], index: 4, kind: input, shape index: {}]   ;;  %s1700_s5 = inlined_call_operand.vmem [shape: bf16[96,32], index: 5, kind: input, shape index: {}]   ;;  %s1701_s6 = inlined_call_operand.vmem [shape: f32[1,32], index: 6, kind: input, shape index: {}]   ;;  %s1702_s7 = inlined_call_operand.vmem [shape: f32[8,32], index: 7, kind: input, shape index: {}]   ;;  %s1703_s8 = inlined_call_operand.hbm [shape: f32[2,8,32], index: 8, kind: output, shape index: {}]  }
   0x1   :  { %15 = vsyncpa [#allocation3 + $0x1], 0  ;;  %s1433_s27 = smov 0   ;;  %s1435_s28 = smov 0  }
   0x2   :  { %s1437_s29 = smov 0   ;;  %s1439_s30 = smov 0  }
   0x3 LB: > { %s1454_s9 = sadd.s32 4294967295, %s1386_s30   ;;  %s1069_s10 = sadd.s32 4294967294, %s1386_s30   ;;  %s1386_s30 = sphi %s1439_s30, %s1709_s30   ;;  %s1382_s29 = sphi %s1437_s29, %s1708_s29   ;;  %s1378_s28 = sphi %s1435_s28, %s1707_s28   ;;  %s1374_s27 = sphi %s1433_s27, %s1706_s27  }
   0x4   : > { %s1458_s11 = sadd.s32 1, %s1386_s30   ;;  %s201_s12 = sadd.s32 1, %s1382_s29 }
   0x5   : > { %s198_s13 = ssub.s32 %s1386_s30, %s1458_s11  ;;  %p211_p0 = scmp.ne.s32.totalorder %s1382_s29, %s1378_s28 }
   0x6   : > { %p199_p1 = scmp.eq.s32.totalorder %s198_s13, 0  ;;  %p212_p2 = scmp.eq.s32.totalorder %s1454_s9, 1 }
   0x7   : > { %p217_p3 = scmp.ne.s32.totalorder %s1378_s28, %s1374_s27  ;;  %p218_p4 = scmp.eq.s32.totalorder %s1069_s10, 1 }
   0x8   : > { %s1469_s14 = scalar_select %p199_p1, %s1382_s29, %s201_s12  }
   0x9   : > { %p1471_p5 = por %p212_p2, %p211_p0  ;;  %p1475_p6 = por %p218_p4, %p217_p3 }
   0xa   : > { %p1072_p7 = scmp.ge.s32.totalorder %s1386_s30, 1  ;;  %p264_p8 = scmp.lt.s32.totalorder %s1386_s30, 3 }
   0xc   : > { %p265_p9 = pnand %p1072_p7, %p264_p8 }
   0xd   : > { %p297_p10 = scmp.lt.s32.totalorder (!%p265_p9), %s1454_s9, 1  ;;  %s294_s26 = sand.u32 (!%p265_p9), 1, %s1378_s28  }
   0xe   : > { %268 = sbr.rel (%p265_p9) target bundleno = 628 (0x274), region = 52  ;;  %s1073_s10 = sshll.u32 (!%p265_p9), %s294_s26, 3 }
   0xf   : > { %s1241_s12 = sshll.u32 (!%p265_p9), %s1454_s9, 3  ;;  %s296_s23 = scalar_lea.vmem (!%p265_p9), [#allocation2], %s1073_s10 }
  0x10   : > { %s1005_s20 = scalar_lea.hbm (!%p265_p9), %s1703_s8, %s1241_s12  ;;  %s1007_s24 = sshll.u32 (!%p265_p9), %s296_s23, 4  ;;  %s1008_s24 = int_to_ptr.vmem [resolvable:$true] %s1007_s24 }
  0x11   : > { %s1344_s18 = scalar_lea.hbm (!%p265_p9), %s1703_s8, 16 }
  0x13   : > { %v304_v0 = vld [vmem:[%s1696_s1] sm:$0xf]  ;;  %vm313_vm0 = vcmask 1043456   ;;  %v1247_v1 = vld [vmem:[%s1698_s3 + $0x18] sm:$0xff]  ;;  %s298_s21 = scalar_select %p297_p10, %s1454_s9, 1  ;;  %vm309_vm1 = vcmask 64512   ;;  %v330_v19 = vlaneseq }
  0x14   : > { %v315_v2 = vsel %vm313_vm0, %v304_v0, 0  ;;  %429 = vmatpush.bf16.msra.mxu1 %v1247_v1  ;;  %v1245_v5 = vld [vmem:[%s1698_s3 + $0x8] sm:$0xff]  ;;  %v1246_v8 = vld [vmem:[%s1698_s3 + $0x10] sm:$0xff]  ;;  %v1244_v9 = vld [vmem:[%s1698_s3] sm:$0xff]  ;;  %vm419_vm2 = vcmask 261120   ;;  %s995_s9 = scalar_lea.sflag [#allocation3], %s294_s26 }
  0x15   : > { %324 = vmatpush.bf16.msra.mxu0 %v315_v2  ;;  %s1074_s22 = sshll.u32 %s298_s21, 3  ;;  %v1249_v6 = vld [vmem:[%s1698_s3 + $0x28] sm:$0xff]  ;;  %457 = vmatpush.bf16.msra.mxu2 %v1245_v5  ;;  %v1248_v10 = vld [vmem:[%s1698_s3 + $0x20] sm:$0xff]  ;;  %v1257_v12 = vld [vmem:[%s1698_s3 + $0x58] sm:$0xff]  ;;  %v331_v21 = vshrl.u32 %v330_v19, 7 }
  0x16   : > { %s300_s25 = scalar_lea.vmem %s1695_s0, %s1074_s22  ;;  %v1255_v7 = vld [vmem:[%s1698_s3 + $0x48] sm:$0xff]  ;;  %489 = vmatpush.bf16.msra.mxu3 %v1249_v6  ;;  %v1254_v11 = vld [vmem:[%s1698_s3 + $0x40] sm:$0xff]  ;;  %v1253_v14 = vld [vmem:[%s1698_s3 + $0x38] sm:$0xff] }
  0x17   : > { %v302_v3 = vld [vmem:[%s300_s25] sm:$0xff]  ;;  %v1259_v13 = vld [vmem:[%s1698_s3 + $0x68] sm:$0xff]  ;;  %v1261_v15 = vld [vmem:[%s1698_s3 + $0x78] sm:$0xff]  ;;  %v1537_v22 = vand.u32 7, %v331_v21  ;;  %s1009_s25 = sshll.u32 %s1005_s20, 4  ;;  %s1010_s25 = int_to_ptr.hbm [resolvable:$true] %s1009_s25 }
  0x18   : > { %v303_v4 = vpack.c.bf16 %v302_v3, %v302_v3  ;;  %430 = vmatpush.bf16.msra.mxu1 %v1246_v8  ;;  %v1256_v16 = vld [vmem:[%s1698_s3 + $0x50] sm:$0xff]  ;;  %v1258_v17 = vld [vmem:[%s1698_s3 + $0x60] sm:$0xff]  ;;  %v1267_v33 = vld [vmem:[%s1698_s3 + $0x98] sm:$0xff]  ;;  %s1338_s13 = sshra.s32 %s1010_s25, 4  ;;  %s1339_s13 = int_to_ptr.hbm [resolvable:$true] %s1338_s13 }
  0x19   : > { %534 = vmatpush.bf16.msrb.mxu0 %v1255_v7  ;;  %458 = vmatpush.bf16.msra.mxu2 %v1244_v9  ;;  %v1252_v18 = vld [vmem:[%s1698_s3 + $0x30] sm:$0xff]  ;;  %v1319_v23 = vld [vmem:[%s1697_s2] ss:$0 sm:$0xff]  ;;  %v363_v24 = vadd.s32 4294967295, %v1537_v22  ;;  %v373_v25 = vadd.s32 1, %v1537_v22  ;;  %v1265_v36 = vld [vmem:[%s1698_s3 + $0x88] sm:$0xff]  ;;  %p1345_p0 = scmp.lt.s32.totalorder %s1339_s13, %s1703_s8 }
  0x1a   : > { %1075 = vmatmul.msk.bf16.vlgmr.msra.gmra.mxu0 %vm309_vm1, %v303_v4  ;;  %490 = vmatpush.bf16.msra.mxu3 %v1248_v10  ;;  %v1260_v20 = vld [vmem:[%s1698_s3 + $0x70] sm:$0xff]  ;;  %v354_v38 = vadd.s32 4294967294, %v1537_v22  ;;  %v1264_v40 = vld [vmem:[%s1698_s3 + $0x80] sm:$0xff]  ;;  %v382_v42 = vadd.s32 2, %v1537_v22  ;;  %v1273_v47 = vld [vmem:[%s1698_s3 + $0xc8] sm:$0xff]  ;;  %v345_v52 = vadd.s32 4294967293, %v1537_v22 }
  0x1b   : > { %vm364_vm3 = vcmp.ge.s32.totalorder %v363_v24, 0  ;;  %vm375_vm4 = vcmp.lt.s32.totalorder %v373_v25, 8  ;;  %v1266_v39 = vld [vmem:[%s1698_s3 + $0x90] sm:$0xff]  ;;  %v1275_v48 = vld [vmem:[%s1698_s3 + $0xd8] sm:$0xff]  ;;  %v1272_v50 = vld [vmem:[%s1698_s3 + $0xc0] sm:$0xff]  ;;  %s1340_s12 = scalar_lea.hbm %s1339_s13, 8 }
  0x1c   : > { %562 = vmatpush.bf16.msrb.mxu1 %v1253_v14  ;;  %vm355_vm5 = vcmp.ge.s32.totalorder %v354_v38, 0  ;;  %vm384_vm6 = vcmp.lt.s32.totalorder %v382_v42, 8  ;;  %v1274_v51 = vld [vmem:[%s1698_s3 + $0xd0] sm:$0xff]  ;;  %vm346_vm7 = vcmp.ge.s32.totalorder %v345_v52, 0  ;;  %v1251_v56 = vld [vmem:[%s1700_s5 + $0x8] sm:$0xff]  ;;  %v1250_v57 = vld [vmem:[%s1700_s5] sm:$0xff]  ;;  %p1341_p11 = scmp.ne.s32.totalorder %s1339_s13, %s1340_s12  ;;  %p1346_p1 = scmp.lt.s32.totalorder %s1344_s18, %s1340_s12 }
  0x1d   : > { %535 = vmatpush.bf16.msrb.mxu0 %v1254_v11  ;;  %591 = vmatpush.bf16.msrb.mxu2 %v1257_v12  ;;  %v1263_v58 = vld [vmem:[%s1700_s5 + $0x18] sm:$0xff]  ;;  %v1270_v61 = vld [vmem:[%s1698_s3 + $0xb0] sm:$0xff]  ;;  %v1269_v0 = vld [vmem:[%s1698_s3 + $0xa8] sm:$0xff] }
  0x1e   : > { %621 = vmatpush.bf16.msrb.mxu3 %v1259_v13  ;;  %v1271_v59 = vld [vmem:[%s1698_s3 + $0xb8] sm:$0xff]  ;;  %v1262_v62 = vld [vmem:[%s1700_s5 + $0x10] sm:$0xff]  ;;  %v1320_v5 = vld [vmem:[%s1699_s4] ss:$0 sm:$0xff]  ;;  %p1342_p12 = pnand %p1341_p11, %p1471_p5  ;;  %p1347_p2 = por %p1346_p1, %p1345_p0 }
  0x1f   : > { %v1268_v8 = vld [vmem:[%s1698_s3 + $0xa0] sm:$0xff] }
  0x20   : > { %563 = vmatpush.bf16.msrb.mxu1 %v1252_v18  ;;  %p1343_p13 = pneg %p1342_p12 }
  0x21   : > { %654 = vmatpush.bf16.msra.mxu0 %v1261_v15  ;;  %592 = vmatpush.bf16.msrb.mxu2 %v1256_v16 }
  0x22   : > { %622 = vmatpush.bf16.msrb.mxu3 %v1258_v17  ;;  %p1348_p3 = pnand %p1347_p2, %p1343_p13 }
  0x25   : > { %655 = vmatpush.bf16.msra.mxu0 %v1260_v20 }
  0x97   : > { %v326_v26 = vpop.f32.mrf.mxu0 }
  0x98   : > { %v1544_v27 = vadd.f32 %v1319_v23, %v326_v26  ;;  %v1321_v23 = vld [vmem:[%s1699_s4 + $0x1] ss:$0 sm:$0xff] }
  0x9a   : > { %v1548_v28 = vpack.c.bf16 %v1544_v27, %v1544_v27  ;;  %v362_v29 = vrot.slane %v1544_v27, 7  ;;  %v372_v30 = vrot.slane %v1544_v27, 1  ;;  %v353_v41 = vrot.slane %v1544_v27, 6 }
  0x9b   : > { %v381_v44 = vrot.slane %v1544_v27, 2  ;;  %v344_v53 = vrot.slane %v1544_v27, 5 }
  0x9c   : > { %1084 = vmatmul.msk.bf16.vlgmr.msra.gmra.mxu1 %vm419_vm2, %v1548_v28  ;;  %v369_v31 = vsel %vm364_vm3, %v362_v29, 0.0  ;;  %v379_v32 = vsel %vm375_vm4, %v372_v30, 0.0  ;;  %v360_v43 = vsel %vm355_vm5, %v353_v41, 0.0 }
  0x9d   : > { %v1557_v34 = vpack.c.bf16 %v369_v31, %v369_v31  ;;  %v380_v35 = vpack.c.bf16 %v379_v32, %v379_v32  ;;  %v361_v45 = vpack.c.bf16 %v360_v43, %v360_v43  ;;  %v388_v46 = vsel %vm384_vm6, %v381_v44, 0.0  ;;  %695 = vmatpush.bf16.msra.mxu1 %v1263_v58  ;;  %v1277_v32 = vld [vmem:[%s1698_s3 + $0xe8] sm:$0xff] }
  0x9e   : > { %v389_v49 = vpack.c.bf16 %v388_v46, %v388_v46  ;;  %v351_v54 = vsel %vm346_vm7, %v344_v53, 0.0  ;;  %v391_v43 = vadd.s32 3, %v1537_v22  ;;  %v390_v44 = vrot.slane %v1544_v27, 3  ;;  %v1278_v22 = vld [vmem:[%s1700_s5 + $0x20] sm:$0xff] }
  0x9f   : > { %v328_v37 = vpop.f32.mrf.mxu0  ;;  %1093 = vmatmul.msk.bf16.vlgmr.msra.gmra.mxu2 %vm419_vm2, %v1557_v34  ;;  %1102 = vmatmul.msk.bf16.vlgmr.msra.gmra.mxu3 %vm419_vm2, %v380_v35  ;;  %v352_v55 = vpack.c.bf16 %v351_v54, %v351_v54 }
  0xa0   : > { %1111 = vmatmul.msk.bf16.vlgmr.msrb.gmra.mxu0 %vm419_vm2, %v1557_v34  ;;  %756 = vmatpush.bf16.msra.mxu3 %v1267_v33  ;;  %vm393_vm8 = vcmp.lt.s32.totalorder %v391_v43, 8 }
  0xa1   : > { %784 = vmatpush.bf16.msrb.mxu0 %v1265_v36  ;;  %723 = vmatpush.bf16.msra.mxu2 %v1251_v56  ;;  %v1276_v36 = vld [vmem:[%s1698_s3 + $0xe0] sm:$0xff]  ;;  %v397_v46 = vsel %vm393_vm8, %v390_v44, 0.0 }
  0xa2   : > { %696 = vmatpush.bf16.msra.mxu1 %v1262_v62 }
  0xa4   : > { %757 = vmatpush.bf16.msra.mxu3 %v1266_v39 }
  0xa5   : > { %785 = vmatpush.bf16.msrb.mxu0 %v1264_v40  ;;  %724 = vmatpush.bf16.msra.mxu2 %v1250_v57 }
  0xac   : > { %1120 = vmatmul.msk.bf16.vlgmr.msrb.gmra.mxu1 %vm419_vm2, %v361_v45 }
  0xad   : > { %813 = vmatpush.bf16.msrb.mxu1 %v1269_v0 }
  0xaf   : > { %1129 = vmatmul.msk.bf16.vlgmr.msrb.gmra.mxu2 %vm419_vm2, %v1548_v28  ;;  %1138 = vmatmul.msk.bf16.vlgmr.msrb.gmra.mxu3 %vm419_vm2, %v380_v35 }
  0xb0   : > { %1147 = vmatmul.msk.bf16.vlgmr.msra.gmra.mxu0 %vm419_vm2, %v389_v49  ;;  %873 = vmatpush.bf16.msrb.mxu3 %v1273_v47  ;;  %v398_v47 = vpack.c.bf16 %v397_v46, %v397_v46 }
  0xb1   : > { %903 = vmatpush.bf16.msra.mxu0 %v1275_v48  ;;  %843 = vmatpush.bf16.msrb.mxu2 %v1271_v59 }
  0xb2   : > { %814 = vmatpush.bf16.msrb.mxu1 %v1268_v8  ;;  %v991_v8 = vld [vmem:[%s1702_s7] sm:$0xff] }
  0xb4   : > { %874 = vmatpush.bf16.msrb.mxu3 %v1272_v50 }
  0xb5   : > { %904 = vmatpush.bf16.msra.mxu0 %v1274_v51  ;;  %844 = vmatpush.bf16.msrb.mxu2 %v1270_v61  ;;  %v1322_v61 = vld [vmem:[%s1699_s4 + $0x2] ss:$0 sm:$0xff] }
  0xbf   : > { %1175 = vmatmul.msk.bf16.vlgmr.msra.gmra.mxu3 %vm419_vm2, %v361_v45 }
  0xc0   : > { %1184 = vmatmul.msk.bf16.vlgmr.msrb.gmra.mxu0 %vm419_vm2, %v352_v55 }
  0xcf   : > { %1211 = vmatmul.msk.bf16.vlgmr.msrb.gmra.mxu3 %vm419_vm2, %v380_v35 }
  0xd0   : > { %1220 = vmatmul.msk.bf16.vlgmr.msra.gmra.mxu0 %vm419_vm2, %v389_v49  ;;  %v1279_v49 = vld [vmem:[%s1700_s5 + $0x28] sm:$0xff] }
 0x119   : > { %v432_v60 = vpop.f32.mrf.mxu1 }
 0x11d   : > { %v537_v63 = vpop.f32.mrf.mxu0 }
 0x121   : > { %v434_v1 = vpop.f32.mrf.mxu1 }
 0x122   : > { %v460_v2 = vpop.f32.mrf.mxu2  ;;  %v492_v3 = vpop.f32.mrf.mxu3 }
 0x123   : > { %v461_v4 = vadd.f32 %v460_v2, %v432_v60 }
 0x125   : > { %v496_v6 = vadd.f32 %v492_v3, %v461_v4  ;;  %v539_v7 = vpop.f32.mrf.mxu0  ;;  %v1323_v4 = vld [vmem:[%s1701_s6] ss:$0 sm:$0xff] }
 0x127   : > { %v501_v9 = vadd.f32 %v1320_v5, %v496_v6 }
 0x129   : > { %v502_v10 = vmax.f32 %v501_v9, 0.0  ;;  %v565_v11 = vpop.f32.mrf.mxu1 }
 0x12a   : > { %v462_v12 = vpop.f32.mrf.mxu2  ;;  %v494_v13 = vpop.f32.mrf.mxu3  ;;  %v566_v16 = vadd.f32 %v565_v11, %v537_v63 }
 0x12b   : > { %v503_v14 = vpack.c.bf16 %v502_v10, %v502_v10 }
 0x12d   : > { %v657_v15 = vpop.f32.mrf.mxu0  ;;  %1166 = vmatmul.msk.bf16.vlgmr.msra.gmra.mxu2 %vm419_vm2, %v503_v14 }
 0x12e   : > { %977 = vmatpush.bf16.msra.mxu2 %v1279_v49 }
 0x131   : > { %v567_v17 = vpop.f32.mrf.mxu1 }
 0x132   : > { %v594_v18 = vpop.f32.mrf.mxu2  ;;  %v624_v19 = vpop.f32.mrf.mxu3  ;;  %978 = vmatpush.bf16.msra.mxu2 %v1278_v22 }
 0x133   : > { %v598_v20 = vadd.f32 %v594_v18, %v566_v16 }
 0x135   : > { %v628_v21 = vadd.f32 %v624_v19, %v598_v20  ;;  %v659_v24 = vpop.f32.mrf.mxu0 }
 0x137   : > { %v661_v25 = vadd.f32 %v657_v15, %v628_v21 }
 0x139   : > { %v667_v26 = vadd.f32 %v1321_v23, %v661_v25 }
 0x13a   : > { %v596_v29 = vpop.f32.mrf.mxu2  ;;  %v626_v30 = vpop.f32.mrf.mxu3 }
 0x13b   : > { %v668_v31 = vmax.f32 %v667_v26, 0.0 }
 0x13d   : > { %v669_v33 = vpack.c.bf16 %v668_v31, %v668_v31  ;;  %v787_v35 = vpop.f32.mrf.mxu0  ;;  %1202 = vmatmul.msk.bf16.vlgmr.msrb.gmra.mxu2 %vm419_vm2, %v1548_v28 }
 0x13f   : > { %1157 = vmatmul.msk.bf16.vlgmr.msra.gmra.mxu1 %vm419_vm2, %v669_v33 }
 0x140   : > { %936 = vmatpush.bf16.msra.mxu1 %v1277_v32 }
 0x142   : > { %v759_v37 = vpop.f32.mrf.mxu3 }
 0x143   : > { %v788_v38 = vadd.f32 %v787_v35, %v759_v37 }
 0x144   : > { %937 = vmatpush.bf16.msra.mxu1 %v1276_v36 }
 0x145   : > { %v789_v39 = vpop.f32.mrf.mxu0 }
 0x14a   : > { %v761_v40 = vpop.f32.mrf.mxu3 }
 0x14d   : > { %v906_v41 = vpop.f32.mrf.mxu0 }
 0x14f   : > { %1193 = vmatmul.msk.bf16.vlgmr.msrb.gmra.mxu1 %vm419_vm2, %v1557_v34 }
 0x152   : > { %v876_v42 = vpop.f32.mrf.mxu3 }
 0x155   : > { %v908_v28 = vpop.f32.mrf.mxu0 }
 0x15a   : > { %v878_v45 = vpop.f32.mrf.mxu3 }
 0x15f   : > { %1229 = vmatmul.msk.bf16.vlgmr.msra.gmra.mxu1 %vm419_vm2, %v398_v47 }
 0x1b0   : > { %v726_v48 = vpop.f32.mrf.mxu2 }
 0x1b8   : > { %v728_v50 = vpop.f32.mrf.mxu2 }
 0x1bc   : > { %v698_v34 = vpop.f32.mrf.mxu1 }
 0x1bd   : > { %v727_v51 = vadd.f32 %v726_v48, %v698_v34 }
 0x1c0   : > { %v846_v52 = vpop.f32.mrf.mxu2 }
 0x1c4   : > { %v700_v53 = vpop.f32.mrf.mxu1 }
 0x1c8   : > { %v848_v54 = vpop.f32.mrf.mxu2 }
 0x1cc   : > { %v816_v55 = vpop.f32.mrf.mxu1 }
 0x1cd   : > { %v820_v56 = vadd.f32 %v816_v55, %v788_v38 }
 0x1cf   : > { %v850_v57 = vadd.f32 %v846_v52, %v820_v56 }
 0x1d1   : > { %v880_v59 = vadd.f32 %v876_v42, %v850_v57 }
 0x1d3   : > { %v910_v60 = vadd.f32 %v906_v41, %v880_v59 }
 0x1d4   : > { %v818_v58 = vpop.f32.mrf.mxu1 }
 0x1dc   : > { %v939_v62 = vpop.f32.mrf.mxu1 }
 0x1dd   : > { %v943_v63 = vadd.f32 %v939_v62, %v910_v60 }
 0x1df   : > { %v949_v0 = vadd.f32 %v1322_v61, %v943_v63 }
 0x1e1   : > { %v950_v1 = vmax.f32 %v949_v0, 0.0 }
 0x1e3   : > { %v951_v2 = vpack.c.bf16 %v950_v1, %v950_v1 }
 0x1e4   : > { %v941_v3 = vpop.f32.mrf.mxu1 }
 0x1e5   : > { %1239 = vmatmul.msk.bf16.vlgmr.msra.gmra.mxu2 %vm419_vm2, %v951_v2 }
 0x268   : > { %v980_v5 = vpop.f32.mrf.mxu2 }
 0x269   : > { %v984_v6 = vadd.f32 %v980_v5, %v727_v51 }
 0x26b   : > { %v989_v7 = vadd.f32 %v1323_v4, %v984_v6 }
 0x26d   : > { %v990_v9 = vadd.f32 %v989_v7, %v1544_v27 }
 0x26f   : > { %v992_v10 = vadd.f32 %v991_v8, %v990_v9 }
 0x270   : > { %v982_v11 = vpop.f32.mrf.mxu2 }
 0x271   : > { %993 = vst.msk [vmem:[%s296_s23] sm:$0xff] %vm419_vm2, %v992_v10 }
 0x272   : > { %1351 = shalt.err (!%p1348_p3)
}
 0x273   : > { %1280 = dma.vmem_to_hbm [thread:$0]  (%p1471_p5), %s1008_s24, 128, %s1010_s25, %s995_s9  }
 0x274 PF: > { %p1286_p4 = scmp.ge.s32.totalorder %s1386_s30, 2  ;;  %s1021_s26 = sand.u32 1, %s1374_s27  }
 0x275   : > { %s1022_s21 = scalar_lea.sflag [#allocation3], %s1021_s26 }
 0x276   : > { %p1283_p7 = pnand %p1286_p4, %p1475_p6 }
 0x278   : > { %p1284_p8 = pneg %p1283_p7 }
 0x27a   : > { %1369 = dma.done.wait (%p1284_p8), %s1022_s21, 128  }
 0x27b   : > { %1371 = vsyncadd (%p1284_p8), %s1022_s21, 4294967168  ;;  %p18_p9 = scmp.ge.s32.totalorder %s1458_s11, 4   ;;  %s1706_s27 = smov %s1378_s28 }
 0x27c   : > { %s1707_s28 = smov %s1382_s29  ;;  %s1708_s29 = smov %s1469_s14 }
 0x27d   : > { %s1709_s30 = smov %s1458_s11  ;;  %20 = sbr.rel (!%p18_p9) target bundleno = 3 (0x3), region = 89 }
 0x282   :  { %1028 = vsyncpa [#allocation3], 1 }
 0x283   :  { %1030 = vsyncpa [#allocation3 + $0x1], 1 }

</bundles_post_ra>
